<compile_context>
chip_gen: v7x
topology: tpu7x:2x2x1
jax: 0.10.0
libtpu: 0.0.40
codegen_flags: <defaults>
</compile_context>

<pallas_src>
import jax
import jax.numpy as jnp
from jax.experimental import pallas as pl
from jax.experimental.pallas import tpu as pltpu

BN_EPS = 1e-5
INV_SQRT2 = 0.7071067811865476


def _gelu_exact(x):
    # PyTorch nn.GELU() default = exact erf formulation.
    return 0.5 * x * (1.0 + jax.lax.erf(x * INV_SQRT2))


def _round_up(x, m):
    return (x + m - 1) // m * m


# ---------------------------------------------------------------------------
# Kernel
# ---------------------------------------------------------------------------
def _make_kernel(k0, sw):
    """Fused 3-matmul TabNet forward for one batch tile.

    Weight slab row layout (bf16, lane width = sw):
      rows [0,      k0)       : W_pre  (folded affine prefix -> hidden), zero-padded
      rows [k0,     k0+sw)    : w2     (BN2-folded), zero-padded to sw x sw
      rows [k0+sw,  k0+2*sw)  : w3, zero-padded
    Bias slab (f32, 8 x sw): row0 = b_pre, row1 = b2, row2 = b3 (zero-padded lanes).
    Padded lanes stay exactly zero through the chain since GELU(0) == 0.
    """
    o1 = k0
    o2 = k0 + sw

    def kernel(u_ref, w_ref, b_ref, out_ref):
        f32, bf16 = jnp.float32, jnp.bfloat16
        b_pre = b_ref[0:1, :]
        b2 = b_ref[1:2, :]
        b3 = b_ref[2:3, :]

        # h1 = GELU([cont | counts] @ W_pre + b_pre)
        z1 = jnp.dot(u_ref[...], w_ref[0:o1, :], preferred_element_type=f32) + b_pre
        h1 = _gelu_exact(z1)
        # h2 = GELU(h1 @ w2 + b2)
        z2 = jnp.dot(h1.astype(bf16), w_ref[o1:o2, :], preferred_element_type=f32) + b2
        h2 = _gelu_exact(z2)
        # out = h2 @ w3 + b3   (stored bf16, lane-dense 128-wide)
        out = jnp.dot(h2.astype(bf16), w_ref[o2:, :], preferred_element_type=f32) + b3
        out_ref[...] = out.astype(out_ref.dtype)

    return kernel


# ---------------------------------------------------------------------------
# Parameters (same layout/semantics as the PyTorch module, weights pre-transposed)
# ---------------------------------------------------------------------------
def init_params(key, *, n_cont, n_bin, embed_dim=64, heads=4,
                hidden_dim=128, min_dim=64, out_dim=32):
    E, E2 = embed_dim, 2 * embed_dim
    d2 = max(hidden_dim // 2, min_dim)          # depth = 1
    ks = jax.random.split(key, 16)
    n = lambda k, s: (0.1 * jax.random.normal(k, s, jnp.float32))
    p = {
        "heads": heads,
        "emb":  n(ks[0], (n_bin, E)),
        "wp_t": n(ks[1], (n_cont, E)),  "bp": n(ks[2], (1, E)),
        # q/k weights exist in the module but are algebraically dead for seq-len 1;
        # kept so the full-semantics reference can use them.
        "wq_t": n(ks[3], (E2, E2)),     "bq": n(ks[4], (1, E2)),
        "wk_t": n(ks[5], (E2, E2)),     "bk": n(ks[6], (1, E2)),
        "wv_t": n(ks[7], (E2, E2)),     "bv": n(ks[8], (1, E2)),
        "wo_t": n(ks[9], (E2, E2)),     "bo": n(ks[10], (1, E2)),
        "w1_t": n(ks[11], (E2, hidden_dim)), "b1": n(ks[12], (1, hidden_dim)),
        "w2_t": n(ks[13], (hidden_dim, d2)), "b2": n(ks[14], (1, d2)),
        "w3_t": n(ks[15], (d2, out_dim)),    "b3": jnp.zeros((1, out_dim), jnp.float32),
        # BatchNorm1d fresh-module statistics / affine params (eval mode)
        "bn1_g": jnp.ones((1, hidden_dim), jnp.float32),
        "bn1_b": jnp.zeros((1, hidden_dim), jnp.float32),
        "bn1_m": jnp.zeros((1, hidden_dim), jnp.float32),
        "bn1_v": jnp.ones((1, hidden_dim), jnp.float32),
        "bn2_g": jnp.ones((1, d2), jnp.float32),
        "bn2_b": jnp.zeros((1, d2), jnp.float32),
        "bn2_m": jnp.zeros((1, d2), jnp.float32),
        "bn2_v": jnp.ones((1, d2), jnp.float32),
    }
    return p


# ---------------------------------------------------------------------------
# Wrapper-side preparation: BN folding, affine-prefix folding, slab packing
# ---------------------------------------------------------------------------
def _fold_bn_into_linear(w_t, b, gamma, beta, mean, var):
    scale = gamma * jax.lax.rsqrt(var + BN_EPS)        # (1, N)
    return w_t * scale, (b - mean) * scale + beta


def _prepare(cont, bin_idx, params):
    f32, bf16 = jnp.float32, jnp.bfloat16
    n_bin, E = params["emb"].shape
    n_cont = params["wp_t"].shape[0]
    E2 = 2 * E
    H1 = params["w1_t"].shape[1]
    D2 = params["w2_t"].shape[1]
    out_dim = params["w3_t"].shape[1]

    n_in = n_cont + n_bin
    K0 = _round_up(n_in, 16)                            # bf16 sublane-tile aligned K
    SW = _round_up(max(H1, D2, out_dim, 128), 128)      # lane width of intermediates/output

    # --- fold eval-mode BatchNorm into the preceding Linears ----------------
    w1f, b1f = _fold_bn_into_linear(params["w1_t"], params["b1"],
                                    params["bn1_g"], params["bn1_b"],
                                    params["bn1_m"], params["bn1_v"])
    w2f, b2f = _fold_bn_into_linear(params["w2_t"], params["b2"],
                                    params["bn2_g"], params["bn2_b"],
                                    params["bn2_m"], params["bn2_v"])

    # --- fold the entire affine prefix into one (n_in, H1) weight -----------
    # x = [cont@wp+bp | counts@emb]  ==  u @ W_x + b_x       (block-diagonal W_x)
    # length-1 attention: softmax over a single key == 1  ->  attn = out_proj(v_proj(x))
    # z1 = attn @ w1f + b1f  ==  u @ W_pre + b_pre           (chain computed in f32)
    W_x = jnp.zeros((n_in, E2), f32)
    W_x = W_x.at[:n_cont, :E].set(params["wp_t"])
    W_x = W_x.at[n_cont:, E:].set(params["emb"])
    b_x = jnp.concatenate([params["bp"][0], jnp.zeros((E,), f32)])

    W_att = W_x @ params["wv_t"] @ params["wo_t"]                               # (n_in, E2)
    b_att = (b_x @ params["wv_t"] + params["bv"][0]) @ params["wo_t"] + params["bo"][0]
    W_pre = W_att @ w1f                                                         # (n_in, H1)
    b_pre = b_att @ w1f + b1f[0]                                                # (H1,)

    # --- pack all weights into ONE bf16 slab, all biases into ONE f32 slab --
    wslab = jnp.zeros((K0 + 2 * SW, SW), f32)
    wslab = wslab.at[:n_in, :H1].set(W_pre)
    wslab = wslab.at[K0:K0 + H1, :D2].set(w2f)
    wslab = wslab.at[K0 + SW:K0 + SW + D2, :out_dim].set(params["w3_t"])
    wslab = wslab.astype(bf16)                           # cast once, after the f32 chain

    bias = jnp.zeros((8, SW), f32)
    bias = bias.at[0, :H1].set(b_pre)
    bias = bias.at[1, :D2].set(b2f[0])
    bias = bias.at[2, :out_dim].set(params["b3"][0])

    # --- single merged bf16 input  [cont | counts | zero-pad] ---------------
    # embed(bin).sum(1) == counts @ embedding_table (counts are small ints; exact in bf16)
    # TODO(synk): for large n_bin, gather embedding rows in-kernel via scalar prefetch
    # instead of building a dense (B, n_bin) counts matrix.
    counts = jnp.sum(jax.nn.one_hot(bin_idx, n_bin, dtype=f32), axis=1)
    B = cont.shape[0]
    u = jnp.zeros((B, K0), f32)
    u = u.at[:, :n_cont].set(cont)
    u = u.at[:, n_cont:n_in].set(counts)
    u = u.astype(bf16)

    arrays = dict(u=u, wslab=wslab, bias=bias)
    meta = dict(k0=K0, sw=SW, out_dim=out_dim)
    return arrays, meta


def _choose_tb(batch, block_b):
    # TB is a multiple of 16 (bf16 sublane packing), at most block_b, and capped so the
    # batch grid has >= 2 steps whenever possible (v7x has 2 TensorCores; the "parallel"
    # axis is sharded across them; no-op on single-TC v5e/v6e).
    b16 = _round_up(batch, 16)
    return min(block_b, max(16, _round_up(b16 // 2, 16)))


def tabnet_forward(cont, bin_idx, params, *, block_b=1024):
    arrays, meta = _prepare(cont, bin_idx, params)
    K0, SW, out_dim = meta["k0"], meta["sw"], meta["out_dim"]
    B = cont.shape[0]
    TB = _choose_tb(B, block_b)
    B_pad = _round_up(B, TB)

    u = arrays["u"]
    if B_pad != B:
        u = jnp.pad(u, ((0, B_pad - B), (0, 0)))
    wslab, bias = arrays["wslab"], arrays["bias"]

    out = pl.pallas_call(
        _make_kernel(K0, SW),
        out_shape=jax.ShapeDtypeStruct((B_pad, SW), jnp.bfloat16),
        grid=(B_pad // TB,),
        in_specs=[pl.BlockSpec((TB, K0), lambda i: (i, 0)),
                  # weight/bias slabs: full-array blocks with constant index -> stay
                  # VMEM-resident across grid steps (fetched once)
                  pl.BlockSpec(wslab.shape, lambda i: (0, 0)),
                  pl.BlockSpec(bias.shape, lambda i: (0, 0))],
        out_specs=pl.BlockSpec((TB, SW), lambda i: (i, 0)),
        compiler_params=pltpu.CompilerParams(
            dimension_semantics=("parallel",),
            vmem_limit_bytes=32 * 1024 * 1024),
    )(u, wslab, bias)
    # bf16 output slab (half the f32 HBM write traffic); slice off pad, cast back to f32
    return out[:B, :out_dim].astype(jnp.float32)


# ---------------------------------------------------------------------------
# References
# ---------------------------------------------------------------------------
def tabnet_ref(cont, bin_idx, params):
    """Pure-JAX f32 reference with full PyTorch semantics (q/k projections,
    softmax over the single key, eval-mode BatchNorm, identity Dropout)."""
    cp = cont @ params["wp_t"] + params["bp"][0]
    be = params["emb"][bin_idx].sum(axis=1)
    x = jnp.concatenate([cp, be], axis=1)
    B, E2 = x.shape
    H = params["heads"]
    Dh = E2 // H
    q = (x @ params["wq_t"] + params["bq"][0]).reshape(B, H, Dh) * (Dh ** -0.5)
    k = (x @ params["wk_t"] + params["bk"][0]).reshape(B, H, Dh)
    v = (x @ params["wv_t"] + params["bv"][0]).reshape(B, H, Dh)
    s = jnp.sum(q * k, axis=-1, keepdims=True)            # single key
    w = jax.nn.softmax(s, axis=-1)                         # == 1
    ctx = (w * v).reshape(B, E2)
    attn = ctx @ params["wo_t"] + params["bo"][0]

    def bn(h, gam, bet, mean, var):
        return (h - mean[0]) * jax.lax.rsqrt(var[0] + BN_EPS) * gam[0] + bet[0]

    h = attn @ params["w1_t"] + params["b1"][0]
    h = _gelu_exact(bn(h, params["bn1_g"], params["bn1_b"], params["bn1_m"], params["bn1_v"]))
    h = h @ params["w2_t"] + params["b2"][0]
    h = _gelu_exact(bn(h, params["bn2_g"], params["bn2_b"], params["bn2_m"], params["bn2_v"]))
    return h @ params["w3_t"] + params["b3"][0]


def tabnet_ref_kernel_precision(cont, bin_idx, params):
    """jnp reference mirroring the kernel's arithmetic exactly (folded affine prefix,
    bf16 matmul operands + f32 accumulation, packed slabs, bf16 output) to validate
    the Pallas lowering."""
    arrays, meta = _prepare(cont, bin_idx, params)
    K0, SW, out_dim = meta["k0"], meta["sw"], meta["out_dim"]
    f32, bf16 = jnp.float32, jnp.bfloat16
    u, w, b = arrays["u"], arrays["wslab"], arrays["bias"]

    def mm(a, wt):
        return jnp.dot(a.astype(bf16), wt, preferred_element_type=f32)

    h1 = _gelu_exact(mm(u, w[:K0]) + b[0:1])
    h2 = _gelu_exact(mm(h1, w[K0:K0 + SW]) + b[1:2])
    out = (mm(h2, w[K0 + SW:]) + b[2:3]).astype(bf16)
    return out[:, :out_dim].astype(f32)


if __name__ == "__main__":
    B, N_CONT, N_BIN, K_BIN = 8, 16, 8, 3
    key = jax.random.PRNGKey(0)
    k_cont, k_bin, k_params = jax.random.split(key, 3)

    cont = jax.random.normal(k_cont, (B, N_CONT), jnp.float32)
    bin_idx = jax.random.randint(k_bin, (B, K_BIN), 0, N_BIN, dtype=jnp.int32)
    params = init_params(k_params, n_cont=N_CONT, n_bin=N_BIN,
                         embed_dim=64, heads=4, hidden_dim=128,
                         min_dim=64, out_dim=32)

    out = jax.block_until_ready(tabnet_forward(cont, bin_idx, params))
    assert out.shape == (B, 32), out.shape

    # Tight check: jnp reference with the kernel's exact arithmetic (folded weights,
    # bf16 MXU operands, f32 accumulation, bf16 output).
    ref_tight = tabnet_ref_kernel_precision(cont, bin_idx, params)
    err_tight = float(jnp.max(jnp.abs(out - ref_tight)))
    # Sanity check: full-precision, full-attention PyTorch-semantics reference.
    ref_f32 = tabnet_ref(cont, bin_idx, params)
    err_f32 = float(jnp.max(jnp.abs(out - ref_f32)))

    if err_tight > 2e-3:
        raise AssertionError(f"kernel vs matched-precision ref: max abs err = {err_tight}")
    if err_f32 > 4e-2:
        raise AssertionError(f"kernel vs f32 reference: max abs err = {err_f32}")
    print("KERNEL_OK")
</pallas_src>

<mosaic_0001>
module attributes {stable_mosaic.version = 11 : i64} {
  func.func @kernel(%arg0: i32, %arg1: memref<16x32xbf16, #tpu.memory_space<vmem>>, %arg2: memref<288x128xbf16, #tpu.memory_space<vmem>>, %arg3: memref<8x128xf32, #tpu.memory_space<vmem>>, %arg4: memref<16x128xbf16, #tpu.memory_space<vmem>>) attributes {dimension_semantics = [#tpu.dimension_semantics<parallel>], iteration_bounds = array<i64: 1>, scalar_prefetch = 0 : i64, scratch_operands = 0 : i64, tpu.core_type = #tpu.core_type<tc>, window_params = [{transform_indices = @transform_0, window_bounds = array<i64: 16, 32>}, {pipeline_mode = #tpu.pipeline_mode<synchronous>, transform_indices = @transform_1, window_bounds = array<i64: 288, 128>}, {pipeline_mode = #tpu.pipeline_mode<synchronous>, transform_indices = @transform_2, window_bounds = array<i64: 8, 128>}, {transform_indices = @transform_3, window_bounds = array<i64: 16, 128>}]} {
    %c0 = arith.constant 0 : index
    %c0_0 = arith.constant 0 : index
    %0 = vector.load %arg3[%c0, %c0_0] : memref<8x128xf32, #tpu.memory_space<vmem>>, vector<1x128xf32>
    %c1 = arith.constant 1 : index
    %c0_1 = arith.constant 0 : index
    %1 = vector.load %arg3[%c1, %c0_1] : memref<8x128xf32, #tpu.memory_space<vmem>>, vector<1x128xf32>
    %c2 = arith.constant 2 : index
    %c0_2 = arith.constant 0 : index
    %2 = vector.load %arg3[%c2, %c0_2] : memref<8x128xf32, #tpu.memory_space<vmem>>, vector<1x128xf32>
    %c0_3 = arith.constant 0 : index
    %c0_4 = arith.constant 0 : index
    %3 = vector.load %arg1[%c0_3, %c0_4] : memref<16x32xbf16, #tpu.memory_space<vmem>>, vector<16x32xbf16>
    %c0_5 = arith.constant 0 : index
    %c0_6 = arith.constant 0 : index
    %4 = vector.load %arg2[%c0_5, %c0_6] : memref<288x128xbf16, #tpu.memory_space<vmem>>, vector<32x128xbf16>
    %cst = arith.constant dense<0.000000e+00> : vector<16x128xf32>
    %5 = tpu.matmul %3, %4, %cst {dimension_numbers = #tpu.dot_dimension_numbers<[1], [0], [0], [1], [0, 0, 1, 1], [], []>} : vector<16x32xbf16>, vector<32x128xbf16>, vector<16x128xf32> -> vector<16x128xf32>
    %6 = vector.broadcast %0 : vector<1x128xf32> to vector<16x128xf32>
    %7 = arith.addf %5, %6 : vector<16x128xf32>
    %cst_7 = arith.constant 5.000000e-01 : f32
    %8 = vector.broadcast %cst_7 : f32 to vector<16x128xf32>
    %9 = arith.mulf %8, %7 : vector<16x128xf32>
    %cst_8 = arith.constant 0.707106769 : f32
    %10 = vector.broadcast %cst_8 : f32 to vector<16x128xf32>
    %11 = arith.mulf %7, %10 : vector<16x128xf32>
    %12 = math.erf %11 : vector<16x128xf32>
    %cst_9 = arith.constant 1.000000e+00 : f32
    %13 = vector.broadcast %cst_9 : f32 to vector<16x128xf32>
    %14 = arith.addf %13, %12 : vector<16x128xf32>
    %15 = arith.mulf %9, %14 : vector<16x128xf32>
    %16 = arith.truncf %15 : vector<16x128xf32> to vector<16x128xbf16>
    %c32 = arith.constant 32 : index
    %c0_10 = arith.constant 0 : index
    %17 = vector.load %arg2[%c32, %c0_10] : memref<288x128xbf16, #tpu.memory_space<vmem>>, vector<128x128xbf16>
    %cst_11 = arith.constant dense<0.000000e+00> : vector<16x128xf32>
    %18 = tpu.matmul %16, %17, %cst_11 {dimension_numbers = #tpu.dot_dimension_numbers<[1], [0], [0], [1], [0, 0, 1, 1], [], []>} : vector<16x128xbf16>, vector<128x128xbf16>, vector<16x128xf32> -> vector<16x128xf32>
    %19 = vector.broadcast %1 : vector<1x128xf32> to vector<16x128xf32>
    %20 = arith.addf %18, %19 : vector<16x128xf32>
    %cst_12 = arith.constant 5.000000e-01 : f32
    %21 = vector.broadcast %cst_12 : f32 to vector<16x128xf32>
    %22 = arith.mulf %21, %20 : vector<16x128xf32>
    %cst_13 = arith.constant 0.707106769 : f32
    %23 = vector.broadcast %cst_13 : f32 to vector<16x128xf32>
    %24 = arith.mulf %20, %23 : vector<16x128xf32>
    %25 = math.erf %24 : vector<16x128xf32>
    %cst_14 = arith.constant 1.000000e+00 : f32
    %26 = vector.broadcast %cst_14 : f32 to vector<16x128xf32>
    %27 = arith.addf %26, %25 : vector<16x128xf32>
    %28 = arith.mulf %22, %27 : vector<16x128xf32>
    %29 = arith.truncf %28 : vector<16x128xf32> to vector<16x128xbf16>
    %c160 = arith.constant 160 : index
    %c0_15 = arith.constant 0 : index
    %30 = vector.load %arg2[%c160, %c0_15] : memref<288x128xbf16, #tpu.memory_space<vmem>>, vector<128x128xbf16>
    %cst_16 = arith.constant dense<0.000000e+00> : vector<16x128xf32>
    %31 = tpu.matmul %29, %30, %cst_16 {dimension_numbers = #tpu.dot_dimension_numbers<[1], [0], [0], [1], [0, 0, 1, 1], [], []>} : vector<16x128xbf16>, vector<128x128xbf16>, vector<16x128xf32> -> vector<16x128xf32>
    %32 = vector.broadcast %2 : vector<1x128xf32> to vector<16x128xf32>
    %33 = arith.addf %31, %32 : vector<16x128xf32>
    %34 = arith.truncf %33 : vector<16x128xf32> to vector<16x128xbf16>
    %c0_17 = arith.constant 0 : index
    %c0_18 = arith.constant 0 : index
    %35 = vector.load %arg4[%c0_17, %c0_18] : memref<16x128xbf16, #tpu.memory_space<vmem>>, vector<16x128xbf16>
    tpu.vector_store %arg4[%c0_17, %c0_18], %34 {strides = array<i32>} : memref<16x128xbf16, #tpu.memory_space<vmem>>, vector<16x128xbf16>,
    return
  }
  func.func @transform_0(%arg0: i32) -> (i32, i32) {
    %c0_i32 = arith.constant 0 : i32
    %c0_i32_0 = arith.constant 0 : i32
    return %arg0, %c0_i32 : i32, i32
  }
  func.func @transform_1(%arg0: i32) -> (i32, i32) {
    %c0_i32 = arith.constant 0 : i32
    %c0_i32_0 = arith.constant 0 : i32
    %c0_i32_1 = arith.constant 0 : i32
    return %c0_i32, %c0_i32_0 : i32, i32
  }
  func.func @transform_2(%arg0: i32) -> (i32, i32) {
    %c0_i32 = arith.constant 0 : i32
    %c0_i32_0 = arith.constant 0 : i32
    %c0_i32_1 = arith.constant 0 : i32
    return %c0_i32, %c0_i32_0 : i32, i32
  }
  func.func @transform_3(%arg0: i32) -> (i32, i32) {
    %c0_i32 = arith.constant 0 : i32
    %c0_i32_0 = arith.constant 0 : i32
    return %arg0, %c0_i32 : i32, i32
  }
}

</mosaic_0001>

<bundles_post_ra>
// kernel: tpu_custom_call.1
= control target key start
LH: loop header
LB: loop body
LE: loop exit
PB: predicated region body
PF: predicated region fallthrough
CT: control target
= control target key end

     0   :  { %8 = vsyncpa [#allocation3], 0  ;;  %s744_s0 = inlined_call_operand.hbm [shape: bf16[16,32], index: 0, kind: input, shape index: {}]   ;;  %s745_s1 = inlined_call_operand.hbm [shape: bf16[288,128], index: 1, kind: input, shape index: {}]   ;;  %s746_s2 = inlined_call_operand.hbm [shape: f32[8,128], index: 2, kind: input, shape index: {}]   ;;  %s747_s3 = inlined_call_operand.hbm [shape: bf16[16,128], index: 3, kind: output, shape index: {}]  }
   0x1   :  { %9 = vsyncpa [#allocation6], 0 }
   0x2   :  { %10 = vsyncpa [#allocation4], 0  ;;  %s628_s12 = smov [#allocation5]   ;;  %s629_s14 = smov [#allocation2]  }
   0x3   :  { %s28_s13 = sshll.u32 %s628_s12, 4  ;;  %s16_s15 = sshll.u32 %s629_s14, 4  ;;  %s29_s13 = int_to_ptr.vmem [resolvable:$true] %s28_s13  ;;  %s656_s15 = int_to_ptr.vmem [resolvable:$true] %s16_s15 }
   0x4   :  { %s534_s18 = scalar_lea.hbm %s745_s1, 2304 }
   0x5   :  { %p535_p0 = scmp.ne.s32.totalorder %s745_s1, %s534_s18  ;;  %p538_p1 = scmp.lt.u32.totalorder %s534_s18, %s745_s1 }
   0x7   :  { %p540_p2 = pnand %p538_p1, %p535_p0 }
   0x9   :  { %543 = shalt.err (!%p540_p2)
}
   0xa   :  { %s544_s23 = scalar_lea.vmem %s29_s13, 2304  ;;  %p549_p4 = scmp.lt.s32.totalorder %s29_s13, %s29_s13 }
   0xb   :  { %p545_p3 = scmp.ne.s32.totalorder %s29_s13, %s544_s23  ;;  %p550_p5 = scmp.lt.s32.totalorder %s544_s23, %s544_s23 }
   0xd   :  { %p551_p6 = por %p550_p5, %p549_p4 }
   0xf   :  { %p552_p7 = pnand %p551_p6, %p545_p3 }
  0x11   :  { %555 = shalt.err (!%p552_p7)
}
  0x12   :  { %s630_s24 = smov 64   ;;  %s631_s25 = smov 4  }
  0x13   :  { %34 = dma.hbm_to_vmem [thread:$0]  %s745_s1, 2304, %s29_s13, [#allocation6], %s630_s24, %s630_s24, %s631_s25  }
  0x14   :  { %s556_s30 = scalar_lea.hbm %s744_s0, 128 }
  0x15   :  { %p557_p8 = scmp.ne.s32.totalorder %s744_s0, %s556_s30  ;;  %p560_p9 = scmp.lt.u32.totalorder %s556_s30, %s744_s0 }
  0x17   :  { %p562_p10 = pnand %p560_p9, %p557_p8 }
  0x19   :  { %565 = shalt.err (!%p562_p10)
}
  0x1a   :  { %s566_s8 = scalar_lea.vmem %s656_s15, 128  ;;  %p571_p12 = scmp.lt.s32.totalorder %s656_s15, %s656_s15 }
  0x1b   :  { %p567_p11 = scmp.ne.s32.totalorder %s656_s15, %s566_s8  ;;  %p572_p13 = scmp.lt.s32.totalorder %s566_s8, %s566_s8 }
  0x1d   :  { %p573_p0 = por %p572_p13, %p571_p12 }
  0x1f   :  { %p574_p1 = pnand %p573_p0, %p567_p11 }
  0x21   :  { %577 = shalt.err (!%p574_p1)
}
  0x22   :  { %22 = dma.hbm_to_vmem [thread:$0]  %s744_s0, 128, %s656_s15, [#allocation3], %s630_s24, %s630_s24, %s631_s25  }
  0x23   :  { %s632_s10 = smov [#allocation7]   ;;  %s578_s14 = scalar_lea.hbm %s746_s2, 128 }
  0x24   :  { %s41_s11 = sshll.u32 %s632_s10, 4  ;;  %p579_p2 = scmp.ne.s32.totalorder %s746_s2, %s578_s14  ;;  %s42_s11 = int_to_ptr.vmem [resolvable:$true] %s41_s11 }
  0x25   :  { %p582_p3 = scmp.lt.u32.totalorder %s578_s14, %s746_s2 }
  0x27   :  { %p584_p4 = pnand %p582_p3, %p579_p2 }
  0x29   :  { %587 = shalt.err (!%p584_p4)
}
  0x2a   :  { %s588_s20 = scalar_lea.vmem %s42_s11, 128  ;;  %p593_p6 = scmp.lt.s32.totalorder %s42_s11, %s42_s11 }
  0x2b   :  { %p589_p5 = scmp.ne.s32.totalorder %s42_s11, %s588_s20  ;;  %p594_p7 = scmp.lt.s32.totalorder %s588_s20, %s588_s20 }
  0x2d   :  { %p595_p8 = por %p594_p7, %p593_p6 }
  0x2f   :  { %p596_p9 = pnand %p595_p8, %p589_p5 }
  0x31   :  { %599 = shalt.err (!%p596_p9)
}
  0x32   :  { %44 = dma.hbm_to_vmem [thread:$0]  %s746_s2, 128, %s42_s11, [#allocation6]  }
  0x33   :  { %622 = dma.done.wait [#allocation3], 128  }
  0x34   :  { %623 = vsyncadd [#allocation3], 4294967168 }
  0x35   :  { %624 = dma.done.wait [#allocation6], 2432  }
  0x36   :  { %625 = vsyncadd [#allocation6], 4294964864  ;;  %v633_v0 = vmov 0.0   ;;  %vm634_vm0 = vmmov 0   ;;  %v507_v1 = vld [vmem:[#allocation5] sm:$0xff]   ;;  %v508_v2 = vld [vmem:[#allocation5 + $0x8] sm:$0xff]  }
  0x37   :  { %451 = vmatprep.subr.bf16.mxu0 %v633_v0  ;;  %455 = vmatprep.mubr.msk.bf16.mxu0 %vm634_vm0, %v633_v0  ;;  %v510_v3 = vld [vmem:[#allocation5 + $0x10] sm:$0xff]   ;;  %v509_v4 = vld [vmem:[#allocation2] sm:$0xff]   ;;  %vm85_vm1 = vcmask 261120   ;;  %v512_v6 = vld [vmem:[#allocation5 + $0x20] sm:$0xff]   ;;  %s635_s2 = smov [#allocation8]  }
  0x38   :  { %459 = vmatprep.subr.bf16.mxu1 %v633_v0  ;;  %475 = vmatprep.mubr.msk.bf16.mxu1 %vm634_vm0, %v633_v0  ;;  %v511_v5 = vld [vmem:[#allocation5 + $0x18] sm:$0xff]   ;;  %v513_v7 = vld [vmem:[#allocation5 + $0x28] sm:$0xff]   ;;  %v514_v8 = vld [vmem:[#allocation5 + $0x30] sm:$0xff]   ;;  %s385_s21 = sshll.u32 %s635_s2, 4  ;;  %s386_s21 = int_to_ptr.vmem [resolvable:$true] %s385_s21 }
  0x39   :  { %452 = vmatpush3.bf16.msra.mxu0 %v507_v1  ;;  %460 = vmatpush3.bf16.msra.mxu1 %v510_v3  ;;  %v515_v9 = vld [vmem:[#allocation5 + $0x38] sm:$0xff]   ;;  %v516_v10 = vld [vmem:[#allocation5 + $0x40] sm:$0xff]   ;;  %v517_v11 = vld [vmem:[#allocation5 + $0x48] sm:$0xff]   ;;  %s600_s22 = scalar_lea.vmem %s386_s21, 128  ;;  %p605_p11 = scmp.lt.s32.totalorder %s386_s21, %s386_s21 }
  0x3a   :  { %453 = vmatprep.subr.bf16.mxu0 %v633_v0  ;;  %461 = vmatprep.subr.bf16.mxu1 %v633_v0  ;;  %v518_v12 = vld [vmem:[#allocation5 + $0x50] sm:$0xff]   ;;  %v519_v13 = vld [vmem:[#allocation5 + $0x58] sm:$0xff]   ;;  %v520_v32 = vld [vmem:[#allocation5 + $0x60] sm:$0xff]   ;;  %p601_p10 = scmp.ne.s32.totalorder %s386_s21, %s600_s22  ;;  %p606_p12 = scmp.lt.s32.totalorder %s600_s22, %s600_s22 }
  0x3b   :  { %v398_v14 = vld [vmem:[#allocation7] ss:$0 sm:$0xff]  ;;  %v521_v33 = vld [vmem:[#allocation5 + $0x68] sm:$0xff]   ;;  %v523_v35 = vld [vmem:[#allocation5 + $0x78] sm:$0xff]  }
  0x3c   :  { %v522_v34 = vld [vmem:[#allocation5 + $0x70] sm:$0xff]   ;;  %v524_v36 = vld [vmem:[#allocation5 + $0x80] sm:$0xff]   ;;  %v525_v37 = vld [vmem:[#allocation5 + $0x88] sm:$0xff]   ;;  %p607_p13 = por %p606_p12, %p605_p11 }
  0x3d   :  { %454 = vmatpush3.bf16.msra.mxu0 %v508_v2  ;;  %462 = vmatpush3.bf16.msra.mxu1 %v511_v5  ;;  %v403_v38 = vld [vmem:[#allocation7 + $0x1] ss:$0 sm:$0xff]  ;;  %v412_v56 = vld [vmem:[#allocation7 + $0x2] ss:$0 sm:$0xff] }
  0x3e   :  { %479 = vmatprep.subr.bf16.mxu0 %v633_v0  ;;  %463 = vmatprep.subr.bf16.mxu1 %v633_v0  ;;  %p608_p0 = pnand %p607_p13, %p601_p10 }
  0x40   :  { %456 = vmatmul.mubr.msk.bf16.vlgmr.msra.gmra.mrb[0].mxu0 %vm85_vm1, %v509_v4 }
  0x41   :  { %495 = vmatprep.mubr.msk.bf16.mxu0 %vm634_vm0, %v633_v0  ;;  %464 = vmatpush3.bf16.msra.mxu1 %v512_v6 }
  0x42   :  { %465 = vmatprep.subr.bf16.mxu1 %v633_v0  ;;  %480 = vmatpush3.bf16.msra.mxu0 %v518_v12 }
  0x43   :  { %481 = vmatprep.subr.bf16.mxu0 %v633_v0 }
  0x45   :  { %466 = vmatpush3.bf16.msra.mxu1 %v513_v7 }
  0x46   :  { %467 = vmatprep.subr.bf16.mxu1 %v633_v0  ;;  %482 = vmatpush3.bf16.msra.mxu0 %v519_v13 }
  0x47   :  { %483 = vmatprep.subr.bf16.mxu0 %v633_v0 }
  0x49   :  { %468 = vmatpush3.bf16.msra.mxu1 %v514_v8 }
  0x4a   :  { %469 = vmatprep.subr.bf16.mxu1 %v633_v0  ;;  %484 = vmatpush3.bf16.msra.mxu0 %v520_v32 }
  0x4b   :  { %485 = vmatprep.subr.bf16.mxu0 %v633_v0 }
  0x4d   :  { %470 = vmatpush3.bf16.msra.mxu1 %v515_v9 }
  0x4e   :  { %471 = vmatprep.subr.bf16.mxu1 %v633_v0  ;;  %486 = vmatpush3.bf16.msra.mxu0 %v521_v33 }
  0x4f   :  { %487 = vmatprep.subr.bf16.mxu0 %v633_v0 }
  0x51   :  { %472 = vmatpush3.bf16.msra.mxu1 %v516_v10 }
  0x52   :  { %473 = vmatprep.subr.bf16.mxu1 %v633_v0  ;;  %488 = vmatpush3.bf16.msra.mxu0 %v522_v34 }
  0x53   :  { %489 = vmatprep.subr.bf16.mxu0 %v633_v0 }
  0x55   :  { %474 = vmatpush3.bf16.msra.mxu1 %v517_v11 }
  0x56   :  { %490 = vmatpush3.bf16.msra.mxu0 %v523_v35 }
  0x57   :  { %491 = vmatprep.subr.bf16.mxu0 %v633_v0 }
  0x5a   :  { %492 = vmatpush3.bf16.msra.mxu0 %v524_v36 }
  0x5b   :  { %493 = vmatprep.subr.bf16.mxu0 %v633_v0 }
  0x5e   :  { %494 = vmatpush3.bf16.msra.mxu0 %v525_v37 }
 0x113   :  { %v123_v15 = vpop.f32.mrb[0].mxu0 }
 0x114   :  { %v124_v16 = vadd.f32 %v398_v14, %v123_v15  ;;  %v457_v17 = vpop.f32.mrb[1].mxu0 }
 0x115   :  { %v126_v18 = vpop.f32.mrb[2].mxu0 }
 0x116   :  { %v132_v19 = vmul.f32 0.70710677, %v124_v16  ;;  %v127_v20 = vadd.f32 %v398_v14, %v126_v18  ;;  %v458_v21 = vpop.f32.mrb[3].mxu0  ;;  %v130_v26 = vmul.f32 0.5, %v124_v16 }
 0x118   :  { %526 = verf.f32 %v132_v19  ;;  %v133_v22 = vmul.f32 0.70710677, %v127_v20  ;;  %v131_v27 = vmul.f32 0.5, %v127_v20 }
 0x11a   :  { %528 = verf.f32 %v133_v22 }
 0x122   :  { %v527_v23 = vpop.eup %526 }
 0x123   :  { %v136_v24 = vadd.f32 1.0, %v527_v23 }
 0x124   :  { %v529_v25 = vpop.eup %528 }
 0x125   :  { %v137_v28 = vadd.f32 1.0, %v529_v25  ;;  %v138_v29 = vmul.f32 %v136_v24, %v130_v26 }
 0x127   :  { %v139_v30 = vmul.f32 %v137_v28, %v131_v27 }
 0x129   :  { %v140_v31 = vpack.c.bf16 %v139_v30, %v138_v29 }
 0x12b   :  { %476 = vmatmul.mubr.bf16.vlgmr.msra.gmra.mrb[0].mxu1 %v140_v31 }
 0x1fe   :  { %v243_v39 = vpop.f32.mrb[0].mxu1 }
 0x1ff   :  { %v244_v40 = vadd.f32 %v403_v38, %v243_v39  ;;  %v477_v41 = vpop.f32.mrb[1].mxu1 }
 0x200   :  { %v246_v42 = vpop.f32.mrb[2].mxu1 }
 0x201   :  { %v252_v43 = vmul.f32 0.70710677, %v244_v40  ;;  %v247_v44 = vadd.f32 %v403_v38, %v246_v42  ;;  %v478_v45 = vpop.f32.mrb[3].mxu1  ;;  %v250_v50 = vmul.f32 0.5, %v244_v40 }
 0x203   :  { %530 = verf.f32 %v252_v43  ;;  %v253_v46 = vmul.f32 0.70710677, %v247_v44  ;;  %v251_v51 = vmul.f32 0.5, %v247_v44 }
 0x205   :  { %532 = verf.f32 %v253_v46 }
 0x20d   :  { %v531_v47 = vpop.eup %530 }
 0x20e   :  { %v256_v48 = vadd.f32 1.0, %v531_v47 }
 0x20f   :  { %v533_v49 = vpop.eup %532 }
 0x210   :  { %v257_v52 = vadd.f32 1.0, %v533_v49  ;;  %v258_v53 = vmul.f32 %v256_v48, %v250_v50 }
 0x212   :  { %v259_v54 = vmul.f32 %v257_v52, %v251_v51 }
 0x214   :  { %v260_v55 = vpack.c.bf16 %v259_v54, %v258_v53 }
 0x216   :  { %496 = vmatmul.mubr.bf16.vlgmr.msra.gmra.mrb[4].mxu0 %v260_v55 }
 0x2e9   :  { %v363_v57 = vpop.f32.mrb[4].mxu0 }
 0x2ea   :  { %v497_v58 = vpop.f32.mrb[5].mxu0  ;;  %v364_v60 = vadd.f32 %v412_v56, %v363_v57 }
 0x2eb   :  { %v366_v59 = vpop.f32.mrb[6].mxu0 }
 0x2ec   :  { %v367_v61 = vadd.f32 %v412_v56, %v366_v59  ;;  %v498_v62 = vpop.f32.mrb[7].mxu0 }
 0x2ee   :  { %v428_v63 = vpack.c.bf16 %v367_v61, %v364_v60 }
 0x2f0   :  { %429 = vst [vmem:[#allocation8] sm:$0xff] %v428_v63  }
 0x2f1   :  { %611 = shalt.err (!%p608_p0)
}
 0x2f2   :  { %s612_s27 = scalar_lea.hbm %s747_s3, 128 }
 0x2f3   :  { %p613_p1 = scmp.ne.s32.totalorder %s747_s3, %s612_s27  ;;  %p616_p2 = scmp.lt.u32.totalorder %s612_s27, %s747_s3 }
 0x2f5   :  { %p618_p3 = pnand %p616_p2, %p613_p1 }
 0x2f7   :  { %621 = shalt.err (!%p618_p3)
}
 0x2f8   :  { %391 = dma.vmem_to_hbm [thread:$0]  %s386_s21, 128, %s747_s3, [#allocation4], %s630_s24, %s630_s24, %s631_s25  }
 0x2f9   :  { %626 = dma.done.wait [#allocation4], 128  }
 0x2fa   :  { %627 = vsyncadd [#allocation4], 4294967168 }
 0x2fb   :  { %395 = vsyncpa [#allocation3], 1 }
 0x2fc   :  { %396 = vsyncpa [#allocation6], 1 }
 0x2fd   :  { %397 = vsyncpa [#allocation4], 1 }

</bundles_post_ra>
